<compile_context>
chip_gen: v7x
topology: tpu7x:2x2x1
jax: 0.10.0
libtpu: 0.0.40
codegen_flags: <defaults>
</compile_context>

<pallas_src>
import jax
import jax.numpy as jnp
from jax.experimental import pallas as pl
from jax.experimental.pallas import tpu as pltpu

_MiB = 1024 * 1024


def _snake_kernel(x_ref, c_ref, o_ref):
    # x_ref: (1, C, Tt); c_ref: (2, C, 1) = [2*alpha, 0.5/(alpha+eps)]; o_ref: (1, C, Tt)
    x = x_ref[...].astype(jnp.float32)            # compute in f32 on every chip
    two_a = c_ref[0][None, :, :]                  # (1, C, 1), broadcast over B, T
    half_inv = c_ref[1][None, :, :]               # (1, C, 1)
    # x + 1/(a+eps) * sin(a*x)^2  ==  x + half_inv - half_inv * cos(2*a*x)
    o_ref[...] = (x + half_inv - half_inv * jnp.cos(two_a * x)).astype(o_ref.dtype)


def _chip_vmem_bytes() -> int:
    """Physical VMEM bytes of the current chip; conservative (v7x) fallback."""
    try:
        return int(pltpu.get_tpu_info().vmem_capacity_bytes)
    except Exception:
        return 64 * _MiB


def _pick_t_tile(T_pad: int, C: int, itemsize: int,
                 target_bytes: int, vmem_limit_bytes: int, min_steps: int) -> int:
    """Largest multiple-of-128 tile dividing T_pad subject to:
       * block bytes ~<= target_bytes (roofline-plateau sized blocks),
       * hard cap so 2x double-buffered (in+out) blocks + scratch fit VMEM,
       * per-row strided-DMA size >= ~2 KiB floor (unless forced smaller),
       * at least `min_steps` tiles along T (megacore sharding at B == 1).
    T_pad must already be a multiple of 128."""
    n128 = T_pad // 128
    row_bytes_per_u = 128 * itemsize                      # bytes per 128 lanes per row
    # Floor: keep strided-DMA rows >= ~2 KiB.
    min_u = max(1, -(-2048 // row_bytes_per_u))
    # Target block size.
    tgt_u = max(min_u, target_bytes // max(1, C * row_bytes_per_u))
    # Hard cap: 4 pipeline buffers (in+out, double-buffered) + headroom.
    hard_u = max(1, (vmem_limit_bytes // 5) // max(1, C * row_bytes_per_u))
    max_u = max(1, min(tgt_u, hard_u))
    # Ensure >= min_steps grid steps along T when possible.
    if min_steps > 1 and n128 >= min_steps:
        max_u = max(1, min(max_u, n128 // min_steps))
    # Largest divisor of n128 that is <= max_u.
    best, d = 1, 1
    while d * d <= n128:
        if n128 % d == 0:
            for cand in (d, n128 // d):
                if cand <= max_u and cand > best:
                    best = cand
        d += 1
    return best * 128


def snake(x: jax.Array,
          alpha: jax.Array,
          *,
          alpha_logscale: bool = False,
          t_tile: int | None = None,
          in_place: bool = False) -> jax.Array:
    """Snake activation. x: (B, C, T), alpha: (C,). bf16 I/O recommended on v5e/v6e."""
    B, C, T = x.shape
    assert alpha.shape == (C,)
    dtype = x.dtype
    itemsize = jnp.dtype(dtype).itemsize

    # Hoist per-channel constants out of the kernel (tiny (C,) ops), packed
    # into a single (2, C, 1) input: [2*alpha_eff, 0.5/(alpha_eff + 1e-9)].
    a_eff = jnp.exp(alpha.astype(jnp.float32)) if alpha_logscale else alpha.astype(jnp.float32)
    consts = jnp.stack([2.0 * a_eff, 0.5 / (a_eff + 1e-9)]).reshape(2, C, 1)

    # Pad T to a multiple of 128 so every block keeps lane-dense 128-multiple
    # stores and the pipeline stays double-buffered for ragged shapes.
    T_pad = ((T + 127) // 128) * 128
    x_in = x if T_pad == T else jnp.pad(x, ((0, 0), (0, 0), (0, T_pad - T)))

    # Generation-aware block-size target / VMEM limit.
    if _chip_vmem_bytes() >= 96 * _MiB:     # v5e / v6e (128 MiB physical VMEM)
        target_bytes, vmem_limit = 8 * _MiB, 64 * _MiB
    else:                                   # v7x (64 MiB) or unknown: conservative
        target_bytes, vmem_limit = 4 * _MiB, 48 * _MiB

    if t_tile is None:
        t_tile = _pick_t_tile(T_pad, C, itemsize, target_bytes, vmem_limit,
                              min_steps=2 if B == 1 else 1)
    assert T_pad % t_tile == 0, "t_tile must divide (padded) T"
    assert t_tile % 128 == 0, "t_tile must be a multiple of 128"

    grid = (B, T_pad // t_tile)

    out = pl.pallas_call(
        _snake_kernel,
        out_shape=jax.ShapeDtypeStruct((B, C, T_pad), dtype),
        grid_spec=pltpu.PrefetchScalarGridSpec(
            num_scalar_prefetch=0,
            grid=grid,
            in_specs=[
                pl.BlockSpec((1, C, t_tile), lambda b, t: (b, 0, t)),
                pl.BlockSpec((2, C, 1), lambda b, t: (0, 0, 0)),
            ],
            out_specs=pl.BlockSpec((1, C, t_tile), lambda b, t: (b, 0, t)),
        ),
        compiler_params=pltpu.CompilerParams(
            # Both axes parallel: lets v7x shard across its 2 TensorCores even
            # when B == 1 (picker guarantees >= 2 T-tiles in that case).
            dimension_semantics=("parallel", "parallel"),
            vmem_limit_bytes=vmem_limit,
        ),
        cost_estimate=pl.CostEstimate(
            flops=4 * B * C * T_pad,
            transcendentals=B * C * T_pad,
            bytes_accessed=2 * B * C * T_pad * itemsize,
        ),
        # Optional in-place update (only a win if the caller donates x at the
        # jit boundary; otherwise XLA inserts a copy).
        input_output_aliases=({0: 0} if in_place else {}),
    )(x_in, consts)

    return out if T_pad == T else out[:, :, :T]


def snake_reference(x, alpha, *, alpha_logscale=False):
    a = alpha[None, :, None].astype(jnp.float32)
    if alpha_logscale:
        a = jnp.exp(a)
    xf = x.astype(jnp.float32)
    return (xf + 1.0 / (a + 1e-9) * jnp.sin(xf * a) ** 2).astype(x.dtype)


if __name__ == "__main__":
    key = jax.random.PRNGKey(0)

    # Small shapes consistent with the module (B, C, T).  T=16 exercises the
    # ragged-T padding path (padded to 128, sliced back).
    B, C, T = 2, 4, 16
    x = jax.random.normal(key, (B, C, T), dtype=jnp.float32)

    # alpha_logscale=False init: torch.ones(in_features) * 1.0
    alpha = jnp.ones((C,), dtype=jnp.float32)
    out = jax.block_until_ready(snake(x, alpha, alpha_logscale=False))
    ref = snake_reference(x, alpha, alpha_logscale=False)
    assert out.shape == (B, C, T) and out.dtype == jnp.float32
    assert jnp.allclose(out, ref, atol=1e-5, rtol=1e-5)

    # logscale branch (alpha = zeros -> exp(alpha) = 1)
    alpha_log = jnp.zeros((C,), dtype=jnp.float32)
    out_log = jax.block_until_ready(snake(x, alpha_log, alpha_logscale=True))
    ref_log = snake_reference(x, alpha_log, alpha_logscale=True)
    assert jnp.allclose(out_log, ref_log, atol=1e-5, rtol=1e-5)

    # Multi-tile grid at B == 1 (picker enforces >= 2 T-tiles for megacore).
    B2, C2, T2 = 1, 8, 512
    x2 = jax.random.normal(jax.random.PRNGKey(0), (B2, C2, T2), dtype=jnp.float32)
    alpha2 = jnp.full((C2,), 0.7, dtype=jnp.float32)
    out2 = jax.block_until_ready(snake(x2, alpha2, alpha_logscale=False))
    ref2 = snake_reference(x2, alpha2, alpha_logscale=False)
    assert jnp.allclose(out2, ref2, atol=1e-5, rtol=1e-5)

    # Explicit t_tile override path.
    out2b = jax.block_until_ready(snake(x2, alpha2, alpha_logscale=False, t_tile=128))
    assert jnp.allclose(out2b, ref2, atol=1e-5, rtol=1e-5)

    # bf16 I/O path (math still done in f32 inside the kernel).
    x3 = x2.astype(jnp.bfloat16)
    out3 = jax.block_until_ready(snake(x3, alpha2, alpha_logscale=False))
    ref3 = snake_reference(x3, alpha2, alpha_logscale=False)
    assert out3.dtype == jnp.bfloat16
    assert jnp.allclose(out3.astype(jnp.float32), ref3.astype(jnp.float32), atol=2e-2, rtol=2e-2)

    print("KERNEL_OK")
</pallas_src>

<mosaic_0001>
module attributes {stable_mosaic.version = 11 : i64} {
  func.func @_snake_kernel(%arg0: i32, %arg1: i32, %arg2: memref<1x4x128xf32, #tpu.memory_space<vmem>>, %arg3: memref<2x4x1xf32, #tpu.memory_space<vmem>>, %arg4: memref<1x4x128xf32, #tpu.memory_space<vmem>>) attributes {dimension_semantics = [#tpu.dimension_semantics<parallel>, #tpu.dimension_semantics<parallel>], iteration_bounds = array<i64: 2, 1>, scalar_prefetch = 0 : i64, scratch_operands = 0 : i64, tpu.core_type = #tpu.core_type<tc>, window_params = [{transform_indices = @transform_0, window_bounds = array<i64: 1, 4, 128>}, {pipeline_mode = #tpu.pipeline_mode<synchronous>, transform_indices = @transform_1, window_bounds = array<i64: 2, 4, 1>}, {transform_indices = @transform_2, window_bounds = array<i64: 1, 4, 128>}]} {
    %c0 = arith.constant 0 : index
    %c0_0 = arith.constant 0 : index
    %c0_1 = arith.constant 0 : index
    %0 = vector.load %arg2[%c0, %c0_0, %c0_1] : memref<1x4x128xf32, #tpu.memory_space<vmem>>, vector<1x4x128xf32>
    %c0_2 = arith.constant 0 : index
    %c0_3 = arith.constant 0 : index
    %c0_4 = arith.constant 0 : index
    %1 = vector.load %arg3[%c0_2, %c0_3, %c0_4] : memref<2x4x1xf32, #tpu.memory_space<vmem>>, vector<1x4x1xf32>
    %2 = vector.shape_cast %1 : vector<1x4x1xf32> to vector<4x1xf32>
    %3 = vector.shape_cast %2 : vector<4x1xf32> to vector<1x4x1xf32>
    %c1 = arith.constant 1 : index
    %c0_5 = arith.constant 0 : index
    %c0_6 = arith.constant 0 : index
    %4 = vector.load %arg3[%c1, %c0_5, %c0_6] : memref<2x4x1xf32, #tpu.memory_space<vmem>>, vector<1x4x1xf32>
    %5 = vector.shape_cast %4 : vector<1x4x1xf32> to vector<4x1xf32>
    %6 = vector.shape_cast %5 : vector<4x1xf32> to vector<1x4x1xf32>
    %7 = vector.broadcast %6 : vector<1x4x1xf32> to vector<1x4x128xf32>
    %8 = arith.addf %0, %7 : vector<1x4x128xf32>
    %9 = vector.broadcast %3 : vector<1x4x1xf32> to vector<1x4x128xf32>
    %10 = arith.mulf %9, %0 : vector<1x4x128xf32>
    %11 = math.cos %10 : vector<1x4x128xf32>
    %12 = vector.broadcast %6 : vector<1x4x1xf32> to vector<1x4x128xf32>
    %13 = arith.mulf %12, %11 : vector<1x4x128xf32>
    %14 = arith.subf %8, %13 : vector<1x4x128xf32>
    %c0_7 = arith.constant 0 : index
    %c0_8 = arith.constant 0 : index
    %c0_9 = arith.constant 0 : index
    %15 = vector.load %arg4[%c0_7, %c0_8, %c0_9] : memref<1x4x128xf32, #tpu.memory_space<vmem>>, vector<1x4x128xf32>
    tpu.vector_store %arg4[%c0_7, %c0_8, %c0_9], %14 {strides = array<i32>} : memref<1x4x128xf32, #tpu.memory_space<vmem>>, vector<1x4x128xf32>,
    return
  }
  func.func @transform_0(%arg0: i32, %arg1: i32) -> (i32, i32, i32) {
    %c0_i32 = arith.constant 0 : i32
    %c0_i32_0 = arith.constant 0 : i32
    return %arg0, %c0_i32, %arg1 : i32, i32, i32
  }
  func.func @transform_1(%arg0: i32, %arg1: i32) -> (i32, i32, i32) {
    %c0_i32 = arith.constant 0 : i32
    %c0_i32_0 = arith.constant 0 : i32
    %c0_i32_1 = arith.constant 0 : i32
    %c0_i32_2 = arith.constant 0 : i32
    return %c0_i32, %c0_i32_0, %c0_i32_1 : i32, i32, i32
  }
  func.func @transform_2(%arg0: i32, %arg1: i32) -> (i32, i32, i32) {
    %c0_i32 = arith.constant 0 : i32
    %c0_i32_0 = arith.constant 0 : i32
    return %arg0, %c0_i32, %arg1 : i32, i32, i32
  }
}

</mosaic_0001>

<bundles_post_ra>
// kernel: tpu_custom_call.1
= control target key start
LH: loop header
LB: loop body
LE: loop exit
PB: predicated region body
PF: predicated region fallthrough
CT: control target
= control target key end

     0   :  { %7 = vsyncpa [#allocation3], 0  ;;  %s705_s0 = inlined_call_operand.vmem [shape: f32[2,4,128], index: 0, kind: input, shape index: {}]   ;;  %s706_s1 = inlined_call_operand.vmem [shape: f32[2,4,1], index: 1, kind: input, shape index: {}]   ;;  %s707_s2 = inlined_call_operand.hbm [shape: f32[2,4,128], index: 2, kind: output, shape index: {}]  }
   0x1   :  { %9 = vsyncpa [#allocation3 + $0x1], 0  ;;  %s562_s9 = smov 0   ;;  %s564_s10 = smov 0  }
   0x2   :  { %s566_s11 = smov 0   ;;  %s568_s12 = smov 0  }
   0x3   :  { %s570_s13 = smov 0   ;;  %s572_s14 = smov 0  }
   0x4 LB: > { %s372_s15 = sadd.s32 4294967295, %s537_s14   ;;  %s373_s16 = sadd.s32 4294967294, %s537_s14   ;;  %s537_s14 = sphi %s572_s14, %s15_s14   ;;  %s533_s13 = sphi %s570_s13, %s714_s13   ;;  %s529_s12 = sphi %s568_s12, %s713_s12   ;;  %s525_s11 = sphi %s566_s11, %s712_s11   ;;  %s521_s10 = sphi %s564_s10, %s711_s10   ;;  %s517_s9 = sphi %s562_s9, %s710_s9  }
   0x5   : > { %s27_s17 = sadd.s32 1, %s533_s13  ;;  %s85_s18 = sadd.s32 1, %s525_s11 }
   0x6   : > { %p29_p0 = scmp.ge.s32.totalorder %s27_s17, 2  ;;  %p95_p1 = scmp.ne.s32.totalorder %s525_s11, %s521_s10 }
   0x7   : > { %p96_p2 = scmp.eq.s32.totalorder %s372_s15, 1  ;;  %p101_p3 = scmp.ne.s32.totalorder %s521_s10, %s517_s9 }
   0x8   : > { %s716_s17 = smov (%p29_p0, %s27_s17), 0  ;;  %p102_p5 = scmp.eq.s32.totalorder %s373_s16, 1 }
   0x9   : > { %p602_p4 = por %p96_p2, %p95_p1  ;;  %s80_s20 = ssub.s32 %s533_s13, %s716_s17 }
   0xa   : > { %p376_p6 = scmp.ge.s32.totalorder %s537_s14, 1  ;;  %p83_p7 = scmp.eq.s32.totalorder %s80_s20, 0 }
   0xb   : > { %p609_p8 = por %p102_p5, %p101_p3  ;;  %p133_p9 = scmp.lt.s32.totalorder %s537_s14, 3 }
   0xc   : > { %s615_s22 = scalar_select %p83_p7, %s525_s11, %s85_s18  }
   0xd   : > { %p134_p10 = pnand %p376_p6, %p133_p9 }
   0xe   : > { %v165_v0 = vld [vmem:[%s706_s1] sm:$0xf] (!%p134_p10)  ;;  %v539_v1 = vmov (!%p134_p10), 0   ;;  %v379_v2 = vld [vmem:[%s706_s1 + $0x4] sm:$0xf] (!%p134_p10)  ;;  %p157_p11 = scmp.lt.s32.totalorder (!%p134_p10), %s529_s12, 1 }
   0xf   : > { %137 = sbr.rel (%p134_p10) target bundleno = 243 (0xf3), region = 28  ;;  %454 = vset.pattern.permute.xlu0 (!%p134_p10), %v539_v1  ;;  %v540_v17 = vmov (!%p134_p10), 2102212464   ;;  %v541_v19 = vmov (!%p134_p10), 920167782   ;;  %s154_s4 = sand.u32 (!%p134_p10), 1, %s521_s10  }
  0x10   : > { %176 = vperm.xlu0 (!%p134_p10), %454, %v165_v0   ;;  %v542_v23 = vmov (!%p134_p10), 1326507024   ;;  %v543_v25 = vmov (!%p134_p10), 683565275   ;;  %v544_v27 = vmov (!%p134_p10), 2475754826  }
  0x11   : > { %v545_v30 = vmov (!%p134_p10), 2131351028   ;;  %s377_s5 = sshll.u32 (!%p134_p10), %s154_s4, 2  ;;  %s385_s6 = sshll.u32 (!%p134_p10), %s529_s12, 6 }
  0x12   : > { %s156_s7 = scalar_lea.vmem (!%p134_p10), [#allocation2], %s377_s5  ;;  %s658_s18 = scalar_lea.hbm (!%p134_p10), %s707_s2, %s385_s6 }
  0x13   : > { %s301_s8 = sshll.u32 (!%p134_p10), %s156_s7, 4  ;;  %s287_s20 = scalar_lea.sflag (!%p134_p10), [#allocation3], %s154_s4  ;;  %s660_s8 = int_to_ptr.vmem [resolvable:$true] %s301_s8 }
  0x14   : > { %170 = vperm.xlu0 (!%p134_p10), %454, %v379_v2   ;;  %s459_s23 = scalar_lea.vmem (!%p134_p10), %s660_s8, 64 }
  0x15   : > { %p460_p12 = scmp.ne.s32.totalorder (!%p134_p10), %s660_s8, %s459_s23 }
  0x16   : > { %s158_s27 = scalar_select %p157_p11, %s529_s12, 1 }
  0x17   : > { %p461_p13 = pnand %p460_p12, %p602_p4  ;;  %s546_s12 = smov [#allocation2]  }
  0x18   : > { %s378_s28 = sshll.u32 %s158_s27, 2  ;;  %s463_s24 = sshll.u32 %s546_s12, 4  ;;  %s464_s24 = int_to_ptr.vmem [resolvable:$false] %s463_s24 }
  0x19   : > { %s163_s3 = scalar_lea.vmem %s705_s0, %s378_s28  ;;  %p462_p0 = pneg %p461_p13 }
  0x1a   : > { %v628_v3 = vld [vmem:[%s163_s3] sm:$0xf]  ;;  %s465_s25 = scalar_lea.vmem %s464_s24, 128  ;;  %p466_p1 = scmp.lt.s32.totalorder %s660_s8, %s464_s24 }
  0x1b   : > { %p467_p2 = scmp.lt.s32.totalorder %s465_s25, %s459_s23 }
  0x1d   : > { %p468_p3 = por %p467_p2, %p466_p1 }
  0x1f   : > { %p469_p5 = pnand %p468_p3, %p462_p0 }
  0x8f   : > { %v177_v4 = vpop.permute.xlu0 %176 }
  0x90   : > { %v631_v5 = vmul.f32 %v177_v4, %v628_v3 }
  0x92   : > { %v183_v6 = vand.u32 2139095040, %v631_v5  ;;  %v180_v7 = vand.u32 2147483647, %v631_v5  ;;  %vm182_vm7 = vcmp.lt.s32.totalorder %v631_v5, 0  ;;  %vm272_vm12 = vweird.f32 %v631_v5 }
  0x94   : > { %v184_v8 = vshrl.u32 %v183_v6, 23  ;;  %v187_v10 = vand.u32 8388607, %v180_v7  ;;  %vm181_vm8 = vcmp.le.f32.partialorder %v180_v7, 0.7853982  ;;  %v171_v7 = vpop.permute.xlu0 %170 }
  0x96   : > { %v380_v9 = vadd.s32 4294967169, %v184_v8  ;;  %v188_v13 = vor.u32 8388608, %v187_v10 }
  0x98   : > { %v190_v11 = vadd.s32 1, %v380_v9  ;;  %v228_v21 = vshll.u32 %v188_v13, 8 }
  0x9a   : > { %vm191_vm0 = vcmp.gt.s32.totalorder %v190_v11, 0 }
  0x9b   : > { %v192_v12 = vsel %vm191_vm0, %v190_v11, 0 }
  0x9c   : > { %v194_v14 = vand.u32 31, %v192_v12  ;;  %v193_v15 = vshrl.u32 %v192_v12, 5 }
  0x9e   : > { %v195_v16 = vsub.s32 32, %v194_v14  ;;  %v206_v18 = vshll.u32 %v540_v17, %v194_v14  ;;  %v209_v20 = vshll.u32 %v541_v19, %v194_v14  ;;  %v197_v26 = vshll.u32 %v543_v25, %v194_v14 }
  0x9f   : > { %v200_v29 = vshll.u32 %v544_v27, %v194_v14  ;;  %v203_v32 = vshll.u32 %v545_v30, %v194_v14  ;;  %vm215_vm1 = vcmp.lt.s32.totalorder %v193_v15, 4  ;;  %vm212_vm2 = vcmp.lt.s32.totalorder %v193_v15, 1 }
  0xa0   : > { %v207_v22 = vshrl.u32 %v541_v19, %v195_v16  ;;  %v210_v24 = vshrl.u32 %v542_v23, %v195_v16  ;;  %v198_v28 = vshrl.u32 %v544_v27, %v195_v16  ;;  %v201_v31 = vshrl.u32 %v545_v30, %v195_v16 }
  0xa1   : > { %v204_v33 = vshrl.u32 %v540_v17, %v195_v16  ;;  %v196_v37 = vshrl.u32 %v543_v25, %v195_v16  ;;  %vm213_vm3 = vcmp.lt.s32.totalorder %v193_v15, 2  ;;  %vm214_vm4 = vcmp.lt.s32.totalorder %v193_v15, 3 }
  0xa2   : > { %v208_v34 = vor.u32 %v207_v22, %v206_v18  ;;  %v211_v35 = vor.u32 %v210_v24, %v209_v20  ;;  %v199_v36 = vor.u32 %v198_v28, %v197_v26  ;;  %v202_v38 = vor.u32 %v201_v31, %v200_v29 }
  0xa3   : > { %v205_v39 = vor.u32 %v204_v33, %v203_v32 }
  0xa4   : > { %v221_v40 = vsel %vm215_vm1, %v208_v34, 920167782  ;;  %v225_v41 = vsel %vm215_vm1, %v211_v35, 1326507024  ;;  %v220_v43 = vsel %vm212_vm2, %v199_v36, %v202_v38  ;;  %v216_v46 = vsel %vm212_vm2, %v196_v37, %v199_v36 }
  0xa5   : > { %v217_v42 = vsel %vm215_vm1, %v205_v39, 2102212464  ;;  %v222_v44 = vsel %vm214_vm4, %v205_v39, %v221_v40  ;;  %v224_v45 = vsel %vm212_vm2, %v202_v38, %v205_v39  ;;  %v226_v49 = vsel %vm214_vm4, %v208_v34, %v225_v41 }
  0xa6   : > { %v218_v47 = vsel %vm214_vm4, %v202_v38, %v217_v42  ;;  %v223_v48 = vsel %vm213_vm3, %v220_v43, %v222_v44  ;;  %v227_v50 = vsel %vm213_vm3, %v224_v45, %v226_v49  ;;  %v173_v35 = vadd.f32 %v171_v7, %v628_v3 }
  0xa7   : > { %v637_v51 = vmul.u32.u64.low %v228_v21, %v223_v48  ;;  %v638_v52 = vmul.u32.u64.high %v228_v21, %v223_v48, %v637_v51  ;;  %v640_v53 = vmul.u32.u64.low %v228_v21, %v227_v50  ;;  %v641_v54 = vmul.u32.u64.high %v228_v21, %v227_v50, %v640_v53 }
  0xa8   : > { %v219_v55 = vsel %vm213_vm3, %v216_v46, %v218_v47 }
  0xa9   : > { %v238_v56 = vadd.s32 1, %v638_v52  ;;  %v235_v57 = vmul.u32 %v228_v21, %v219_v55  ;;  %vm237_vm5 = vc.u32 %v641_v54, %v637_v51  ;;  %v236_v8 = vadd.s32 %v637_v51, %v641_v54 }
  0xab   : > { %v239_v58 = vsel %vm237_vm5, %v238_v56, %v638_v52 }
  0xac   : > { %v240_v59 = vadd.s32 %v239_v58, %v235_v57 }
  0xae   : > { %v241_v60 = vadd.s32 536870912, %v240_v59 }
  0xb0   : > { %v242_v61 = vshrl.u32 %v241_v60, 30 }
  0xb2   : > { %v243_v62 = vshll.u32 %v242_v61, 30  ;;  %v266_v22 = vsub.s32 4, %v242_v61 }
  0xb4   : > { %v244_v63 = vsub.s32 %v240_v59, %v243_v62  ;;  %v267_v24 = vsel %vm182_vm7, %v266_v22, %v242_v61 }
  0xb5   : > { %v269_v25 = vsel %vm181_vm8, 0, %v267_v24 }
  0xb6   : > { %v246_v0 = vsub.s32 0, %v244_v63  ;;  %v273_v26 = vand.u32 3, %v269_v25 }
  0xb8   : > { %v381_v1 = vmin.u32 %v246_v0, %v244_v63  ;;  %vm278_vm9 = vcmp.eq.s32.totalorder %v273_v26, 2  ;;  %vm275_vm10 = vcmp.eq.s32.totalorder %v273_v26, 0  ;;  %vm274_vm11 = vcmp.lt.s32.totalorder %v273_v26, 2 }
  0xba   : > { %v248_v2 = vclz %v381_v1 }
  0xbc   : > { %v382_v4 = vadd.s32 4294967294, %v248_v2 }
  0xbe   : > { %vm383_vm6 = vcmp.lt.s32.totalorder %v382_v4, 0 }
  0xbf   : > { %v251_v6 = vsel %vm383_vm6, 0, %v382_v4 }
  0xc0   : > { %v252_v9 = vsub.s32 32, %v251_v6  ;;  %v256_v10 = vsub.s32 4294967266, %v251_v6  ;;  %v253_v11 = vshll.u32 %v244_v63, %v251_v6 }
  0xc2   : > { %v254_v12 = vshrl.u32 %v236_v8, %v252_v9  ;;  %v257_v13 = vadd.s32 127, %v256_v10 }
  0xc4   : > { %v255_v14 = vor.u32 %v254_v12, %v253_v11  ;;  %v258_v15 = vshll.u32 %v257_v13, 23 }
  0xc6   : > { %v259_v16 = vor.u32 4788187, %v258_v15  ;;  %v262_v18 = vcvt.s32.f32 %v255_v14 }
  0xc8   : > { %v260_v17 = vand.u32 2147483647, %v259_v16 }
  0xca   : > { %v263_v19 = vmul.f32 %v262_v18, %v260_v17 }
  0xcc   : > { %v264_v20 = vxor.u32 2147483648, %v263_v19 }
  0xce   : > { %v265_v21 = vsel %vm182_vm7, %v264_v20, %v263_v19 }
  0xcf   : > { %v268_v23 = vsel %vm181_vm8, %v631_v5, %v265_v21 }
  0xd0   : > { %455 = vcosq.f32 %v268_v23 }
  0xd1   : > { %457 = vsinq.f32 %v268_v23 }
  0xda   : > { %v456_v27 = vpop.eup %455 }
  0xdb   : > { %v458_v28 = vpop.eup %457  ;;  %v279_v29 = vxor.u32 2147483648, %v456_v27 }
  0xdc   : > { %v276_v30 = vxor.u32 2147483648, %v458_v28 }
  0xdd   : > { %v280_v31 = vsel %vm278_vm9, %v279_v29, %v458_v28 }
  0xde   : > { %v277_v32 = vsel %vm275_vm10, %v456_v27, %v276_v30 }
  0xdf   : > { %v281_v33 = vsel %vm274_vm11, %v277_v32, %v280_v31 }
  0xe0   : > { %v282_v34 = vsel %vm272_vm12, nan, %v281_v33 }
  0xe1   : > { %v283_v36 = vmul.f32 %v282_v34, %v171_v7 }
  0xe3   : > { %v284_v37 = vsub.f32 %v173_v35, %v283_v36 }
  0xe5   : > { %285 = vst [vmem:[%s156_s7] sm:$0xf] %v284_v37 }
  0xe6   : > { %472 = shalt.err (!%p469_p5)
}
  0xe7   : > { %s473_s26 = scalar_lea.hbm %s658_s18, 64  ;;  %s477_s29 = scalar_lea.hbm %s707_s2, 128 }
  0xe8   : > { %p474_p6 = scmp.ne.s32.totalorder %s658_s18, %s473_s26  ;;  %p478_p10 = scmp.lt.u32.totalorder %s658_s18, %s707_s2 }
  0xe9   : > { %p479_p11 = scmp.lt.u32.totalorder %s477_s29, %s473_s26  ;;  %p481_p13 = scmp.lt.u32.totalorder %s473_s26, %s658_s18 }
  0xea   : > { %p475_p7 = pnand %p474_p6, %p602_p4 }
  0xeb   : > { %p480_p12 = por %p479_p11, %p478_p10 }
  0xec   : > { %p476_p9 = pneg %p475_p7 }
  0xed   : > { %p482_p0 = por %p481_p13, %p480_p12 }
  0xef   : > { %p483_p1 = pnand %p482_p0, %p476_p9 }
  0xf1   : > { %486 = shalt.err (!%p483_p1)
}
  0xf2   : > { %392 = dma.vmem_to_hbm [thread:$0]  (%p602_p4), %s660_s8, 64, %s658_s18, %s287_s20  }
  0xf3 PF: > { %p398_p2 = scmp.ge.s32.totalorder %s537_s14, 2  ;;  %s313_s4 = sand.u32 1, %s517_s9  }
  0xf4   : > { %s314_s5 = scalar_lea.sflag [#allocation3], %s313_s4 }
  0xf5   : > { %p395_p3 = pnand %p398_p2, %p609_p8 }
  0xf7   : > { %512 = dma.done.wait (!%p395_p3), %s314_s5, 64  }
  0xf8   : > { %514 = vsyncadd (!%p395_p3), %s314_s5, 4294967232  ;;  %s15_s14 = sadd.s32 1, %s537_s14   ;;  %s710_s9 = smov %s521_s10 }
  0xf9   : > { %p12_p5 = scmp.ge.s32.totalorder %s15_s14, 4   ;;  %s711_s10 = smov %s525_s11 }
  0xfa   : > { %s712_s11 = smov %s615_s22  ;;  %s713_s12 = smov %s533_s13 }
  0xfb   : > { %s714_s13 = smov %s716_s17  ;;  %14 = sbr.rel (!%p12_p5) target bundleno = 4 (0x4), region = 64 }
 0x102   :  { %319 = vsyncpa [#allocation3], 1 }
 0x103   :  { %321 = vsyncpa [#allocation3 + $0x1], 1 }

</bundles_post_ra>
